<compile_context>
chip_gen: v7x
topology: tpu7x:2x2x1
jax: 0.10.0
libtpu: 0.0.40
codegen_flags: <defaults>
</compile_context>

<pallas_src>
import functools

import jax
import jax.numpy as jnp
from jax import lax
from jax.experimental import pallas as pl
from jax.experimental.pallas import tpu as pltpu


def _topk_last(x, k):
    """Top-k values along the last axis -> (..., k).

    TODO(synk): for k > 1 exactly-tied scores are masked out together, unlike
    torch.sort which keeps duplicates (exact for k == 1, the module default).
    """
    outs = []
    cur = x
    for t in range(k):
        mx = jnp.max(cur, axis=-1, keepdims=True)
        outs.append(mx)
        if t + 1 < k:
            cur = jnp.where(cur == mx, -jnp.inf, cur)
    return outs[0] if k == 1 else jnp.concatenate(outs, axis=-1)


def _topk_first(x, k):
    """Top-k values along the first axis -> (k, ...)."""
    outs = []
    cur = x
    for t in range(k):
        mx = jnp.max(cur, axis=0, keepdims=True)
        outs.append(mx)
        if t + 1 < k:
            cur = jnp.where(cur == mx, -jnp.inf, cur)
    return outs[0] if k == 1 else jnp.concatenate(outs, axis=0)


def _hn_loss_kernel(m_ref, q_ref, out_ref,
                    acc_ref, row_top_ref, dcol_ref, *col_scratch,
                    margin, nmax, contrast, tile, q_resident):
    i = pl.program_id(0)            # row block (outer)
    j = pl.program_id(1)            # column block (inner, sequential)
    ni = pl.num_programs(0)
    nj = pl.num_programs(1)

    if contrast:
        col_top_ref, drow_ref = col_scratch

    # ------------------------------ init ------------------------------
    @pl.when(jnp.logical_and(i == 0, j == 0))
    def _init_global():
        acc_ref[...] = jnp.zeros(acc_ref.shape, jnp.float32)
        if contrast:
            col_top_ref[...] = jnp.full(col_top_ref.shape, -jnp.inf, jnp.float32)

    @pl.when(j == 0)
    def _init_row_sweep():
        row_top_ref[...] = jnp.full(row_top_ref.shape, -jnp.inf, jnp.float32)

    # --------------------------- scores tile ---------------------------
    m = m_ref[...]                                            # (tile, D)
    if q_resident:
        q = q_ref[pl.ds(pl.multiple_of(j * tile, tile), tile), :]
    else:
        q = q_ref[...]                                        # (tile, D)

    # scores[r, c] = <m_r, q_c>: contract on D directly (no q transpose),
    # f32 accumulation on the MXU regardless of the input dtype.
    scores = lax.dot_general(
        m, q, dimension_numbers=(((1,), (1,)), ((), ())),
        preferred_element_type=jnp.float32)                   # (tile, tile)

    # Square tiles => diagonal elements live only on diagonal blocks (i == j).
    r_iota = lax.broadcasted_iota(jnp.int32, (tile, tile), 0)
    c_iota = lax.broadcasted_iota(jnp.int32, (tile, tile), 1)
    local_diag = r_iota == c_iota
    on_diag = i == j

    @pl.when(on_diag)
    def _grab_diag():
        dvals = jnp.where(local_diag, scores, 0.0)
        dcol_ref[...] = jnp.sum(dvals, axis=1, keepdims=True)          # (tile, 1)
        if contrast:
            off = pl.multiple_of(j * tile, tile)
            drow_ref[:, pl.ds(off, tile)] = jnp.sum(dvals, axis=0,
                                                    keepdims=True)     # (1, tile)

    # Zero the diagonal (reference: scores - diag(diag(scores))).  Note that a
    # zeroed diagonal can still win the max when all off-diagonal scores are
    # negative -- exactly like the PyTorch module.
    scores = jnp.where(jnp.logical_and(on_diag, local_diag), 0.0, scores)

    # ---------------- streaming row top-nmax (neg_m) ----------------
    tile_row_top = _topk_last(scores, nmax)                            # (tile, nmax)
    if nmax == 1:
        row_top_ref[...] = jnp.maximum(row_top_ref[...], tile_row_top)
    else:
        merged = jnp.concatenate([row_top_ref[...], tile_row_top], axis=-1)
        row_top_ref[...] = _topk_last(merged, nmax)

    # ---------------- streaming column top-nmax (neg_q) ----------------
    if contrast:                    # trace-time gated: zero cost for default
        off = pl.multiple_of(j * tile, tile)
        tile_col_top = _topk_first(scores, nmax)                       # (nmax, tile)
        prev = col_top_ref[:, pl.ds(off, tile)]
        if nmax == 1:
            col_top_ref[:, pl.ds(off, tile)] = jnp.maximum(prev, tile_col_top)
        else:
            merged = jnp.concatenate([prev, tile_col_top], axis=0)
            col_top_ref[:, pl.ds(off, tile)] = _topk_first(merged, nmax)

    # ---------------- epilogues: O(N) work, never O(N^2) ----------------
    @pl.when(j == nj - 1)                    # row block i fully reduced
    def _row_epilogue():
        vals = row_top_ref[...] + (margin - dcol_ref[...])             # (tile, nmax)
        acc_ref[...] += jnp.sum(jnp.maximum(vals, 0.0), keepdims=True)

    if contrast:
        @pl.when(i == ni - 1)                # column block j fully reduced
        def _col_epilogue():
            off = pl.multiple_of(j * tile, tile)
            vals = (col_top_ref[:, pl.ds(off, tile)]
                    + (margin - drow_ref[:, pl.ds(off, tile)]))        # (nmax, tile)
            acc_ref[...] += jnp.sum(jnp.maximum(vals, 0.0), keepdims=True)

    @pl.when(jnp.logical_and(i == ni - 1, j == nj - 1))
    def _finalize():
        out_ref[...] = acc_ref[...]


def hard_negative_contrastive_loss(m, q, *, nmax=1, margin=0.2, contrast=False,
                                   block_n=256,
                                   q_resident_bytes=4 * 1024 * 1024):
    """m: (N, D), q: (N, D) -> scalar float32 loss.

    block_n: edge of the square score tile.  256 fits comfortably in
    v5e/v6e VMEM; halve it (or set vmem_limit_bytes) on v7x's 64 MiB VMEM
    for large D.  For best MXU utilization, pad D to a multiple of 128.
    """
    assert m.ndim == 2 and q.ndim == 2 and m.shape == q.shape
    assert nmax >= 1
    n, d = m.shape

    tile = n if n <= block_n else int(block_n)
    # TODO(synk): pad N up to a tile multiple instead of requiring divisibility.
    assert n % tile == 0, "N must be divisible by the tile size"
    n_blocks = n // tile
    if n_blocks > 1:
        assert tile % 128 == 0, "multi-block tiles must be lane-aligned (128)"

    # Keep q fully resident in VMEM if small enough; otherwise stream tiles.
    q_resident = n * d * q.dtype.itemsize <= q_resident_bytes

    kernel = functools.partial(
        _hn_loss_kernel, margin=float(margin), nmax=int(nmax),
        contrast=bool(contrast), tile=tile, q_resident=bool(q_resident))

    scratch = [
        pltpu.VMEM((1, 1), jnp.float32),            # scalar loss accumulator
        pltpu.VMEM((tile, nmax), jnp.float32),      # running row top-nmax
        pltpu.VMEM((tile, 1), jnp.float32),         # diag of current row block
    ]
    if contrast:
        scratch += [
            pltpu.VMEM((nmax, n), jnp.float32),     # running column top-nmax
            pltpu.VMEM((1, n), jnp.float32),        # diag, row layout
        ]

    m_spec = pl.BlockSpec((tile, d), lambda i, j: (i, 0))       # stationary over j
    if q_resident:
        q_spec = pl.BlockSpec((n, d), lambda i, j: (0, 0))      # loaded once
    else:
        q_spec = pl.BlockSpec((tile, d), lambda i, j: (j, 0))   # streamed

    out = pl.pallas_call(
        kernel,
        out_shape=jax.ShapeDtypeStruct((1, 1), jnp.float32),
        grid_spec=pltpu.PrefetchScalarGridSpec(
            num_scalar_prefetch=0,
            grid=(n_blocks, n_blocks),
            in_specs=[m_spec, q_spec],
            out_specs=pl.BlockSpec((1, 1), lambda i, j: (0, 0)),
            scratch_shapes=scratch),
        # Both grid axes carry accumulator state in per-core scratch, so keep
        # them sequential.
        # TODO(synk): per-core partial sums to exploit v7x's two TensorCores.
        compiler_params=pltpu.CompilerParams(
            dimension_semantics=("arbitrary", "arbitrary")),
    )(m, q)
    return out[0, 0]


def _reference_loss(m, q, *, nmax=1, margin=0.2, contrast=False):
    m = m.astype(jnp.float32)
    q = q.astype(jnp.float32)
    scores = jnp.matmul(m, q.T, precision=jax.lax.Precision.HIGHEST)
    diag = jnp.diag(scores)
    scores = scores - jnp.diag(diag)
    sorted_query = jnp.sort(scores, axis=0)[::-1, :]   # descending along dim 0
    sorted_model = jnp.sort(scores, axis=1)[:, ::-1]   # descending along dim 1
    max_q = sorted_query[:nmax, :]
    max_m = sorted_model[:, :nmax]
    neg_q = jnp.sum(jnp.maximum(max_q + (margin - diag)[None, :], 0.0))
    neg_m = jnp.sum(jnp.maximum(max_m + (margin - diag)[:, None], 0.0))
    return neg_m + neg_q if contrast else neg_m


if __name__ == "__main__":
    key = jax.random.PRNGKey(0)
    k1, k2, k3, k4 = jax.random.split(key, 4)

    # Small shapes consistent with the module: batch N=8, hidden D=32.
    N, D = 8, 32
    m = jax.random.normal(k1, (N, D), dtype=jnp.float32)
    q = jax.random.normal(k2, (N, D), dtype=jnp.float32)

    for contrast in (False, True):
        loss = hard_negative_contrastive_loss(m, q, nmax=1, margin=0.2,
                                              contrast=contrast)
        jax.block_until_ready(loss)
        ref = _reference_loss(m, q, nmax=1, margin=0.2, contrast=contrast)
        assert jnp.allclose(loss, ref, rtol=1e-5, atol=1e-5), (contrast, loss, ref)

    # Exercise the multi-block streaming path (2x2 grid of 128x128 tiles),
    # once with q resident in VMEM and once with q streamed.
    N2, D2 = 256, 32
    m2 = jax.random.normal(k3, (N2, D2), dtype=jnp.float32)
    q2 = jax.random.normal(k4, (N2, D2), dtype=jnp.float32)
    ref2 = _reference_loss(m2, q2, nmax=1, margin=0.2, contrast=True)
    for qbytes in (4 * 1024 * 1024, 0):       # resident / streamed
        loss2 = hard_negative_contrastive_loss(
            m2, q2, nmax=1, margin=0.2, contrast=True,
            block_n=128, q_resident_bytes=qbytes)
        jax.block_until_ready(loss2)
        assert jnp.allclose(loss2, ref2, rtol=1e-4, atol=1e-3), (qbytes, loss2, ref2)

    print("KERNEL_OK")
</pallas_src>

<mosaic_0001>
module attributes {stable_mosaic.version = 11 : i64} {
  func.func @_hn_loss_kernel(%arg0: i32, %arg1: i32, %arg2: memref<8x32xf32, #tpu.memory_space<vmem>>, %arg3: memref<8x32xf32, #tpu.memory_space<vmem>>, %arg4: memref<1x1xf32, #tpu.memory_space<vmem>>, %arg5: memref<1x1xf32, #tpu.memory_space<vmem>>, %arg6: memref<8x1xf32, #tpu.memory_space<vmem>>, %arg7: memref<8x1xf32, #tpu.memory_space<vmem>>) attributes {dimension_semantics = [#tpu.dimension_semantics<arbitrary>, #tpu.dimension_semantics<arbitrary>], iteration_bounds = array<i64: 1, 1>, scalar_prefetch = 0 : i64, scratch_operands = 3 : i64, tpu.core_type = #tpu.core_type<tc>, window_params = [{transform_indices = @transform_0, window_bounds = array<i64: 8, 32>}, {pipeline_mode = #tpu.pipeline_mode<synchronous>, transform_indices = @transform_1, window_bounds = array<i64: 8, 32>}, {pipeline_mode = #tpu.pipeline_mode<synchronous>, transform_indices = @transform_2, window_bounds = array<i64: 1, 1>}]} {
    %c0_i32 = arith.constant 0 : i32
    %0 = arith.cmpi eq, %arg0, %c0_i32 : i32
    %c0_i32_0 = arith.constant 0 : i32
    %1 = arith.cmpi eq, %arg1, %c0_i32_0 : i32
    %2 = arith.andi %0, %1 : i1
    %3 = arith.extui %2 : i1 to i32
    %c0_i32_1 = arith.constant 0 : i32
    %4 = arith.cmpi ne, %3, %c0_i32_1 : i32
    scf.if %4 {
      %cst_18 = arith.constant 0.000000e+00 : f32
      %37 = vector.broadcast %cst_18 : f32 to vector<1x1xf32>
      %c0_19 = arith.constant 0 : index
      %c0_20 = arith.constant 0 : index
      %38 = vector.load %arg5[%c0_19, %c0_20] : memref<1x1xf32, #tpu.memory_space<vmem>>, vector<1x1xf32>
      tpu.vector_store %arg5[%c0_19, %c0_20], %37 {strides = array<i32>} : memref<1x1xf32, #tpu.memory_space<vmem>>, vector<1x1xf32>,
    } else {
    }
    %c0_i32_2 = arith.constant 0 : i32
    %5 = arith.cmpi eq, %arg1, %c0_i32_2 : i32
    %6 = arith.extui %5 : i1 to i32
    %c0_i32_3 = arith.constant 0 : i32
    %7 = arith.cmpi ne, %6, %c0_i32_3 : i32
    scf.if %7 {
      %cst_18 = arith.constant 0xFF800000 : f32
      %37 = vector.broadcast %cst_18 : f32 to vector<8x1xf32>
      %c0_19 = arith.constant 0 : index
      %c0_20 = arith.constant 0 : index
      %38 = vector.load %arg6[%c0_19, %c0_20] : memref<8x1xf32, #tpu.memory_space<vmem>>, vector<8x1xf32>
      tpu.vector_store %arg6[%c0_19, %c0_20], %37 {strides = array<i32>} : memref<8x1xf32, #tpu.memory_space<vmem>>, vector<8x1xf32>,
    } else {
    }
    %c0 = arith.constant 0 : index
    %c0_4 = arith.constant 0 : index
    %8 = vector.load %arg2[%c0, %c0_4] : memref<8x32xf32, #tpu.memory_space<vmem>>, vector<8x32xf32>
    %c8_i32 = arith.constant 8 : i32
    %9 = arith.muli %arg1, %c8_i32 : i32
    %10 = tpu.assume_multiple %9, 8 : i32
    %11 = arith.index_cast %10 : i32 to index
    %c0_5 = arith.constant 0 : index
    %12 = vector.load %arg3[%11, %c0_5] : memref<8x32xf32, #tpu.memory_space<vmem>>, vector<8x32xf32>
    %cst = arith.constant dense<0.000000e+00> : vector<8x8xf32>
    %13 = tpu.matmul %8, %12, %cst {dimension_numbers = #tpu.dot_dimension_numbers<[1], [1], [0], [0], [0, 0, 1, 0], [], []>} : vector<8x32xf32>, vector<8x32xf32>, vector<8x8xf32> -> vector<8x8xf32>
    %14 = tpu.iota {dimensions = array<i32: 0>} : vector<8x8xi32>
    %15 = tpu.iota {dimensions = array<i32: 1>} : vector<8x8xi32>
    %16 = arith.cmpi eq, %14, %15 : vector<8x8xi32>
    %17 = arith.cmpi eq, %arg0, %arg1 : i32
    %18 = arith.extui %17 : i1 to i32
    %c0_i32_6 = arith.constant 0 : i32
    %19 = arith.cmpi ne, %18, %c0_i32_6 : i32
    scf.if %19 {
      %cst_18 = arith.constant 0.000000e+00 : f32
      %37 = vector.broadcast %cst_18 : f32 to vector<8x8xf32>
      %38 = arith.select %16, %13, %37 : vector<8x8xi1>, vector<8x8xf32>
      %cst_19 = arith.constant dense<0.000000e+00> : vector<8xf32>
      %39 = vector.multi_reduction <add>, %38, %cst_19 [1] : vector<8x8xf32> to vector<8xf32>
      %40 = vector.shape_cast %39 : vector<8xf32> to vector<8x1xf32>
      %c0_20 = arith.constant 0 : index
      %c0_21 = arith.constant 0 : index
      %41 = vector.load %arg7[%c0_20, %c0_21] : memref<8x1xf32, #tpu.memory_space<vmem>>, vector<8x1xf32>
      tpu.vector_store %arg7[%c0_20, %c0_21], %40 {strides = array<i32>} : memref<8x1xf32, #tpu.memory_space<vmem>>, vector<8x1xf32>,
    } else {
    }
    %20 = vector.broadcast %17 : i1 to vector<8x8xi1>
    %21 = arith.andi %20, %16 : vector<8x8xi1>
    %cst_7 = arith.constant 0.000000e+00 : f32
    %22 = vector.broadcast %cst_7 : f32 to vector<8x8xf32>
    %23 = arith.select %21, %22, %13 : vector<8x8xi1>, vector<8x8xf32>
    %cst_8 = arith.constant dense<0xFF800000> : vector<8xf32>
    %24 = vector.multi_reduction <maximumf>, %23, %cst_8 [1] : vector<8x8xf32> to vector<8xf32>
    %25 = vector.shape_cast %24 : vector<8xf32> to vector<8x1xf32>
    %c0_9 = arith.constant 0 : index
    %c0_10 = arith.constant 0 : index
    %26 = vector.load %arg6[%c0_9, %c0_10] : memref<8x1xf32, #tpu.memory_space<vmem>>, vector<8x1xf32>
    %27 = arith.maximumf %26, %25 : vector<8x1xf32>
    %c0_11 = arith.constant 0 : index
    %c0_12 = arith.constant 0 : index
    %28 = vector.load %arg6[%c0_11, %c0_12] : memref<8x1xf32, #tpu.memory_space<vmem>>, vector<8x1xf32>
    tpu.vector_store %arg6[%c0_11, %c0_12], %27 {strides = array<i32>} : memref<8x1xf32, #tpu.memory_space<vmem>>, vector<8x1xf32>,
    %c0_i32_13 = arith.constant 0 : i32
    %29 = arith.cmpi eq, %arg1, %c0_i32_13 : i32
    %30 = arith.extui %29 : i1 to i32
    %c0_i32_14 = arith.constant 0 : i32
    %31 = arith.cmpi ne, %30, %c0_i32_14 : i32
    scf.if %31 {
      %c0_18 = arith.constant 0 : index
      %c0_19 = arith.constant 0 : index
      %37 = vector.load %arg6[%c0_18, %c0_19] : memref<8x1xf32, #tpu.memory_space<vmem>>, vector<8x1xf32>
      %c0_20 = arith.constant 0 : index
      %c0_21 = arith.constant 0 : index
      %38 = vector.load %arg7[%c0_20, %c0_21] : memref<8x1xf32, #tpu.memory_space<vmem>>, vector<8x1xf32>
      %cst_22 = arith.constant 2.000000e-01 : f32
      %39 = vector.broadcast %cst_22 : f32 to vector<8x1xf32>
      %40 = arith.subf %39, %38 : vector<8x1xf32>
      %41 = arith.addf %37, %40 : vector<8x1xf32>
      %c0_23 = arith.constant 0 : index
      %c0_24 = arith.constant 0 : index
      %42 = vector.load %arg5[%c0_23, %c0_24] : memref<1x1xf32, #tpu.memory_space<vmem>>, vector<1x1xf32>
      %cst_25 = arith.constant 0.000000e+00 : f32
      %43 = vector.broadcast %cst_25 : f32 to vector<8x1xf32>
      %44 = arith.maximumf %41, %43 : vector<8x1xf32>
      %45 = vector.shape_cast %44 : vector<8x1xf32> to vector<1x8x1xf32>
      %cst_26 = arith.constant dense<0.000000e+00> : vector<1xf32>
      %46 = vector.multi_reduction <add>, %45, %cst_26 [1, 2] : vector<1x8x1xf32> to vector<1xf32>
      %47 = vector.shape_cast %46 : vector<1xf32> to vector<1x1x1xf32>
      %48 = vector.extract %47[0, 0, 0] : f32 from vector<1x1x1xf32>
      %49 = vector.broadcast %48 : f32 to vector<1x1xf32>
      %50 = arith.addf %42, %49 : vector<1x1xf32>
      %c0_27 = arith.constant 0 : index
      %c0_28 = arith.constant 0 : index
      %51 = vector.load %arg5[%c0_27, %c0_28] : memref<1x1xf32, #tpu.memory_space<vmem>>, vector<1x1xf32>
      tpu.vector_store %arg5[%c0_27, %c0_28], %50 {strides = array<i32>} : memref<1x1xf32, #tpu.memory_space<vmem>>, vector<1x1xf32>,
    } else {
    }
    %c0_i32_15 = arith.constant 0 : i32
    %32 = arith.cmpi eq, %arg0, %c0_i32_15 : i32
    %c0_i32_16 = arith.constant 0 : i32
    %33 = arith.cmpi eq, %arg1, %c0_i32_16 : i32
    %34 = arith.andi %32, %33 : i1
    %35 = arith.extui %34 : i1 to i32
    %c0_i32_17 = arith.constant 0 : i32
    %36 = arith.cmpi ne, %35, %c0_i32_17 : i32
    scf.if %36 {
      %c0_18 = arith.constant 0 : index
      %c0_19 = arith.constant 0 : index
      %37 = vector.load %arg5[%c0_18, %c0_19] : memref<1x1xf32, #tpu.memory_space<vmem>>, vector<1x1xf32>
      %c0_20 = arith.constant 0 : index
      %c0_21 = arith.constant 0 : index
      %38 = vector.load %arg4[%c0_20, %c0_21] : memref<1x1xf32, #tpu.memory_space<vmem>>, vector<1x1xf32>
      tpu.vector_store %arg4[%c0_20, %c0_21], %37 {strides = array<i32>} : memref<1x1xf32, #tpu.memory_space<vmem>>, vector<1x1xf32>,
    } else {
    }
    return
  }
  func.func @transform_0(%arg0: i32, %arg1: i32) -> (i32, i32) {
    %c0_i32 = arith.constant 0 : i32
    %c0_i32_0 = arith.constant 0 : i32
    return %arg0, %c0_i32 : i32, i32
  }
  func.func @transform_1(%arg0: i32, %arg1: i32) -> (i32, i32) {
    %c0_i32 = arith.constant 0 : i32
    %c0_i32_0 = arith.constant 0 : i32
    %c0_i32_1 = arith.constant 0 : i32
    return %c0_i32, %c0_i32_0 : i32, i32
  }
  func.func @transform_2(%arg0: i32, %arg1: i32) -> (i32, i32) {
    %c0_i32 = arith.constant 0 : i32
    %c0_i32_0 = arith.constant 0 : i32
    %c0_i32_1 = arith.constant 0 : i32
    return %c0_i32, %c0_i32_0 : i32, i32
  }
}

</mosaic_0001>

<bundles_post_ra>
// kernel: tpu_custom_call.1
= control target key start
LH: loop header
LB: loop body
LE: loop exit
PB: predicated region body
PF: predicated region fallthrough
CT: control target
= control target key end

     0   :  { %7 = vsyncpa [#allocation6], 0  ;;  %s356_s0 = inlined_call_operand.hbm [shape: f32[8,32], index: 0, kind: input, shape index: {}]   ;;  %s357_s1 = inlined_call_operand.hbm [shape: f32[8,32], index: 1, kind: input, shape index: {}]   ;;  %s358_s2 = inlined_call_operand.hbm [shape: f32[1,1], index: 2, kind: output, shape index: {}]  }
   0x1   :  { %8 = vsyncpa [#allocation9], 0 }
   0x2   :  { %9 = vsyncpa [#allocation7], 0  ;;  %s292_s9 = smov [#allocation5]   ;;  %s293_s11 = smov [#allocation8]  }
   0x3   :  { %s16_s10 = sshll.u32 %s292_s9, 4  ;;  %s26_s12 = sshll.u32 %s293_s11, 4  ;;  %s17_s10 = int_to_ptr.vmem [resolvable:$true] %s16_s10  ;;  %s27_s12 = int_to_ptr.vmem [resolvable:$true] %s26_s12 }
   0x4   :  { %s220_s15 = scalar_lea.hbm %s356_s0, 128 }
   0x5   :  { %p221_p0 = scmp.ne.s32.totalorder %s356_s0, %s220_s15  ;;  %p224_p1 = scmp.lt.u32.totalorder %s220_s15, %s356_s0 }
   0x7   :  { %p226_p2 = pnand %p224_p1, %p221_p0 }
   0x9   :  { %229 = shalt.err (!%p226_p2)
}
   0xa   :  { %s230_s20 = scalar_lea.vmem %s17_s10, 128  ;;  %p235_p4 = scmp.lt.s32.totalorder %s17_s10, %s17_s10 }
   0xb   :  { %p231_p3 = scmp.ne.s32.totalorder %s17_s10, %s230_s20  ;;  %p236_p5 = scmp.lt.s32.totalorder %s230_s20, %s230_s20 }
   0xd   :  { %p237_p6 = por %p236_p5, %p235_p4 }
   0xf   :  { %p238_p7 = pnand %p237_p6, %p231_p3 }
  0x11   :  { %241 = shalt.err (!%p238_p7)
}
  0x12   :  { %19 = dma.hbm_to_vmem [thread:$0]  %s356_s0, 128, %s17_s10, [#allocation6]  }
  0x13   :  { %s242_s25 = scalar_lea.hbm %s357_s1, 128 }
  0x14   :  { %p243_p8 = scmp.ne.s32.totalorder %s357_s1, %s242_s25  ;;  %p246_p9 = scmp.lt.u32.totalorder %s242_s25, %s357_s1 }
  0x16   :  { %p248_p10 = pnand %p246_p9, %p243_p8 }
  0x18   :  { %251 = shalt.err (!%p248_p10)
}
  0x19   :  { %s252_s30 = scalar_lea.vmem %s27_s12, 128  ;;  %p257_p12 = scmp.lt.s32.totalorder %s27_s12, %s27_s12 }
  0x1a   :  { %p253_p11 = scmp.ne.s32.totalorder %s27_s12, %s252_s30  ;;  %p258_p13 = scmp.lt.s32.totalorder %s252_s30, %s252_s30 }
  0x1c   :  { %p259_p0 = por %p258_p13, %p257_p12 }
  0x1e   :  { %p260_p1 = pnand %p259_p0, %p253_p11 }
  0x20   :  { %263 = shalt.err (!%p260_p1)
}
  0x21   :  { %29 = dma.hbm_to_vmem [thread:$0]  %s357_s1, 128, %s27_s12, [#allocation9]  }
  0x22   :  { %286 = dma.done.wait [#allocation6], 128  }
  0x23   :  { %287 = vsyncadd [#allocation6], 4294967168 }
  0x24   :  { %288 = dma.done.wait [#allocation9], 128  }
  0x25   :  { %289 = vsyncadd [#allocation9], 4294967168  ;;  %vm42_vm0 = vcmask 0   ;;  %v294_v0 = vmov 0.0   ;;  %vm295_vm1 = vmmov 0   ;;  %vm53_vm2 = vcmask 261120  }
  0x26   :  { %43 = vst.msk [vmem:[#allocation2] sm:$0x1] %vm42_vm0, %v294_v0  ;;  %207 = vmatprep.subr.mxu0 %v294_v0  ;;  %209 = vmatprep.mubr.msk.f32.mxu0 %vm295_vm1, %v294_v0  ;;  %v52_v1 = vld [vmem:[#allocation8] sm:$0xff]  ;;  %v49_v2 = vld [vmem:[#allocation5] sm:$0xff]  ;;  %vm47_vm3 = vcmask 7168   ;;  %v296_v3 = vmov -inf   ;;  %v130_v4 = vlaneseq }
  0x27   :  { %208 = vmatpush3.xpose.msk.msra.mxu0 %vm53_vm2, %v52_v1  ;;  %48 = vst.msk [vmem:[#allocation3] sm:$0xff] %vm47_vm3, %v296_v3  ;;  %vm140_vm5 = vcmask 64512   ;;  %s297_s4 = smov [#allocation10]  }
  0x28   :  { %v131_v5 = vshrl.u32 %v130_v4, 7  ;;  %v133_v6 = vand.u32 127, %v130_v4  ;;  %s193_s5 = sshll.u32 %s297_s4, 4  ;;  %s194_s5 = int_to_ptr.vmem [resolvable:$true] %s193_s5 }
  0x29   :  { %s264_s6 = scalar_lea.vmem %s194_s5, 16  ;;  %s268_s7 = scalar_lea.vmem %s194_s5, 32 }
  0x2a   :  { %210 = vmatmul.mubr.msk.f32.vlgmr.msra.gmra.mrb[0].mxu0 %vm53_vm2, %v49_v2  ;;  %vm134_vm4 = vcmp.eq.s32.totalorder %v131_v5, %v133_v6  ;;  %p265_p2 = scmp.ne.s32.totalorder %s194_s5, %s264_s6  ;;  %p269_p3 = scmp.lt.s32.totalorder %s194_s5, %s194_s5 }
  0x2b   :  { %p270_p4 = scmp.lt.s32.totalorder %s268_s7, %s264_s6 }
  0x2d   :  { %v166_v30 = vld [vmem:[#allocation2] sm:$0x1]  ;;  %p271_p5 = por %p270_p4, %p269_p3 }
  0x2e   :  { %v155_v14 = vld [vmem:[#allocation3] sm:$0xff] }
  0x2f   :  { %p272_p6 = pnand %p271_p5, %p265_p2 }
  0xfd   :  { %v126_v7 = vpop.f32.mrb[0].mxu0 }
  0xfe   :  { %v211_v8 = vpop.f32.mrb[1].mxu0  ;;  %v139_v9 = vsel %vm134_vm4, %v126_v7, 0.0  ;;  %v150_v11 = vsel %vm134_vm4, 0.0, %v126_v7 }
  0xff   :  { %v141_v10 = vsel %vm140_vm5, %v139_v9, 0.0  ;;  %v152_v12 = vsel %vm140_vm5, %v150_v11, -inf }
 0x100   :  { %142 = vadd.xlane.f32.xlu0 %v141_v10 }
 0x104   :  { %153 = vmax.xlane.f32.xlu0 %v152_v12 }
 0x18d   :  { %v143_v13 = vpop.xlane.xlu0 %142 }
 0x18e   :  { %145 = vst.msk [vmem:[#allocation4] sm:$0xff] %vm47_vm3, %v143_v13 }
 0x191   :  { %v154_v15 = vpop.xlane.xlu0 %153 }
 0x192   :  { %v156_v16 = vmax.f32 %v155_v14, %v154_v15 }
 0x194   :  { %158 = vst.msk [vmem:[#allocation3] sm:$0xff] %vm47_vm3, %v156_v16 }
 0x195   :  { %v163_v17 = vld [vmem:[#allocation4] sm:$0xff] }
 0x196   :  { %v164_v18 = vsub.f32 0.2, %v163_v17 }
 0x19b   :  { %v162_v19 = vld [vmem:[#allocation3] sm:$0xff] }
 0x19c   :  { %v165_v20 = vadd.f32 %v164_v18, %v162_v19 }
 0x19e   :  { %v167_v21 = vmax.f32 %v165_v20, 0.0 }
 0x1a0   :  { %v168_v22 = vsel %vm47_vm3, %v167_v21, 0.0 }
 0x1a1   :  { %169 = vadd.xlane.f32.xlu1 %v168_v22 }
 0x22e   :  { %v170_v23 = vpop.xlane.xlu1 %169 }
 0x22f   :  { %v171_v24 = vrot.slane %v170_v23, 4 }
 0x231   :  { %v172_v25 = vadd.f32 %v171_v24, %v170_v23 }
 0x233   :  { %v173_v26 = vrot.slane %v172_v25, 2 }
 0x235   :  { %v174_v27 = vadd.f32 %v173_v26, %v172_v25 }
 0x237   :  { %v175_v28 = vrot.slane %v174_v27, 1 }
 0x239   :  { %v176_v29 = vadd.f32 %v175_v28, %v174_v27 }
 0x23b   :  { %212 = vpush %v176_v29 }
 0x26c   :  { %s213_s1 = spop %212 }
 0x26d   :  { %v178_v31 = vstv %s213_s1 }
 0x26e   :  { %v179_v32 = vadd.f32 %v178_v31, %v166_v30 }
 0x270   :  { %181 = vst.msk [vmem:[#allocation2] sm:$0x1] %vm42_vm0, %v179_v32 }
 0x277   :  { %v184_v33 = vld [vmem:[#allocation2] sm:$0x1] }
 0x278   :  { %186 = vst.msk [vmem:[#allocation10] sm:$0x1] %vm42_vm0, %v184_v33 }
 0x279   :  { %275 = shalt.err (!%p272_p6)
}
 0x27a   :  { %s276_s10 = scalar_lea.hbm %s358_s2, 16 }
 0x27b   :  { %p277_p7 = scmp.ne.s32.totalorder %s358_s2, %s276_s10  ;;  %p280_p8 = scmp.lt.u32.totalorder %s276_s10, %s358_s2 }
 0x27d   :  { %p282_p9 = pnand %p280_p8, %p277_p7 }
 0x27f   :  { %285 = shalt.err (!%p282_p9)
}
 0x280   :  { %196 = dma.vmem_to_hbm [thread:$0]  %s194_s5, 16, %s358_s2, [#allocation7]  }
 0x281   :  { %290 = dma.done.wait [#allocation7], 16  }
 0x282   :  { %291 = vsyncadd [#allocation7], 4294967280 }
 0x283   :  { %200 = vsyncpa [#allocation6], 1 }
 0x284   :  { %201 = vsyncpa [#allocation9], 1 }
 0x285   :  { %202 = vsyncpa [#allocation7], 1 }

</bundles_post_ra>
